<compile_context>
chip_gen: v5e
topology: v5e:2x2
jax: 0.10.0
libtpu: 0.0.40
codegen_flags: <defaults>
</compile_context>

<pallas_src>
import jax
import jax.numpy as jnp
from jax.experimental import pallas as pl
from jax.experimental.pallas import tpu as pltpu

KH, KW = 5, 5  # first conv kernel size


def _component1_kernel(p_ref, w1_ref, w_ref, b_ref, o_ref):
    # p_ref : (K1p, L)        im2col patches + ones-row + zero pad, L = BT*Ho*Wo
    # w1_ref: (alpha, K1p)    layer-1 weights with b1 folded into column K1
    # w_ref : (3, alpha, alpha)  stacked 1x1 weights [w2; w3; w4 zero-padded]
    # b_ref : (3, alpha, 1)      stacked biases      [b2; b3; b4 zero-padded]
    # o_ref : (1, L)          lane-dense output row
    p = p_ref[...]

    # layer 1: 5x5 valid conv as ONE K=K1p MXU matmul (bias via ones-row)
    h = jnp.dot(w1_ref[...], p, preferred_element_type=jnp.float32)
    h = jnp.maximum(h, 0.0)                                        # (alpha, L)

    # layer 2: 1x1 conv + ReLU (spatial*batch stays on the lane axis)
    h = jnp.dot(w_ref[0], h, preferred_element_type=jnp.float32) + b_ref[0]
    h = jnp.maximum(h, 0.0)

    # layer 3: 1x1 conv + ReLU
    h = jnp.dot(w_ref[1], h, preferred_element_type=jnp.float32) + b_ref[1]
    h = jnp.maximum(h, 0.0)

    # layer 4: 1x1 conv to a single channel -> lane-dense (1, L) row
    w4 = w_ref[2][0:1, :]                                          # (1, alpha)
    b4 = b_ref[2][0:1, :]                                          # (1, 1)
    y = jnp.dot(w4, h, preferred_element_type=jnp.float32) + b4
    o_ref[...] = y.astype(o_ref.dtype)


def _pick_batch_tile(B):
    """Images packed into lanes per grid step. Prefer BT | B and grid >= 2
    (v7x has 2 TensorCores); cap at 16 (16*144 lanes -> ~0.5 MiB patch block)."""
    for bt in (16, 8, 4, 2):
        if B % bt == 0 and B // bt >= 2:
            return bt
    return 1


def component1_forward(x_nchw, params, batch_tile=None):
    """x_nchw: (B, 2, H, W) float32. Returns (B, 1, Ho, Wo), Ho=H-4, Wo=W-4."""
    w1, b1, w2, b2, w3, b3, w4, b4 = params                        # PyTorch layouts
    B, Cin, H, W = x_nchw.shape
    alpha = w1.shape[0]
    Ho, Wo = H - KH + 1, W - KW + 1
    N = Ho * Wo
    K1 = KH * KW * Cin
    K1p = ((K1 + 1 + 7) // 8) * 8            # +1 ones-row (bias), pad to 8 sublanes

    BT = batch_tile if batch_tile is not None else _pick_batch_tile(B)
    assert B % BT == 0, (B, BT)
    G = B // BT
    L = BT * N

    # ---- im2col straight from NCHW (no transposes); rows ordered (kh, kw, cin)
    slices = [x_nchw[:, :, kh:kh + Ho, kw:kw + Wo]
              for kh in range(KH) for kw in range(KW)]             # (B, Cin, Ho, Wo) each
    p = jnp.stack(slices, axis=1)                                  # (B, 25, Cin, Ho, Wo)
    p = p.reshape(G, BT, K1, N)
    p = jnp.transpose(p, (0, 2, 1, 3))                             # (G, K1, BT, N)  (fused with the stack by XLA)
    p = p.reshape(G, K1, L)
    p = jnp.concatenate(
        [p,
         jnp.ones((G, 1, L), p.dtype),                             # ones-row -> b1
         jnp.zeros((G, K1p - K1 - 1, L), p.dtype)], axis=1)        # (G, K1p, L)

    # ---- weights: fold b1 into w1; stack the 1x1 layers into single operands
    w1t = jnp.transpose(w1, (0, 2, 3, 1)).reshape(alpha, K1)       # (alpha, K1) (kh,kw,cin)
    w1_aug = jnp.concatenate(
        [w1t, b1.reshape(alpha, 1),
         jnp.zeros((alpha, K1p - K1 - 1), w1t.dtype)], axis=1)     # (alpha, K1p)

    w4_pad = jnp.zeros((alpha, alpha), w4.dtype).at[0].set(w4.reshape(alpha))
    w234 = jnp.stack([w2.reshape(alpha, alpha),
                      w3.reshape(alpha, alpha),
                      w4_pad], axis=0)                             # (3, alpha, alpha)

    b4_pad = jnp.zeros((alpha,), b4.dtype).at[0].set(b4[0])
    b234 = jnp.stack([b2, b3, b4_pad], axis=0).reshape(3, alpha, 1)

    def full(shape):
        return pl.BlockSpec(shape, lambda g, _s=len(shape): (0,) * _s)

    out = pl.pallas_call(
        _component1_kernel,
        out_shape=jax.ShapeDtypeStruct((G, 1, L), jnp.float32),
        grid_spec=pltpu.PrefetchScalarGridSpec(
            num_scalar_prefetch=0,
            grid=(G,),
            in_specs=[
                pl.BlockSpec((pl.Squeezed(), K1p, L), lambda g: (g, 0, 0)),
                full((alpha, K1p)),
                full((3, alpha, alpha)),
                full((3, alpha, 1)),
            ],
            out_specs=pl.BlockSpec((pl.Squeezed(), 1, L), lambda g: (g, 0, 0)),
        ),
        compiler_params=pltpu.CompilerParams(
            dimension_semantics=("parallel",)),
    )(p, w1_aug, w234, b234)

    # lane order per block is (bt, ho, wo) -> direct reshape back to NCHW
    return out.reshape(B, Ho, Wo)[:, None, :, :]


def init_params(key, alpha, cin=2):
    """Deterministic parameter init; shapes match the PyTorch module (OIHW)."""
    ks = jax.random.split(key, 8)
    w1 = jax.random.normal(ks[0], (alpha, cin, KH, KW), jnp.float32) * 0.1
    b1 = jax.random.normal(ks[1], (alpha,), jnp.float32) * 0.1
    w2 = jax.random.normal(ks[2], (alpha, alpha, 1, 1), jnp.float32) * 0.1
    b2 = jax.random.normal(ks[3], (alpha,), jnp.float32) * 0.1
    w3 = jax.random.normal(ks[4], (alpha, alpha, 1, 1), jnp.float32) * 0.1
    b3 = jax.random.normal(ks[5], (alpha,), jnp.float32) * 0.1
    w4 = jax.random.normal(ks[6], (1, alpha, 1, 1), jnp.float32) * 0.1
    b4 = jax.random.normal(ks[7], (1,), jnp.float32) * 0.1
    return (w1, b1, w2, b2, w3, b3, w4, b4)


def reference_forward(x_nchw, params):
    """Pure-JAX reference (lax conv, NCHW/OIHW like PyTorch) to validate."""
    w1, b1, w2, b2, w3, b3, w4, b4 = params
    dn = ('NCHW', 'OIHW', 'NCHW')
    h = jax.lax.conv_general_dilated(x_nchw, w1, (1, 1), 'VALID',
                                     dimension_numbers=dn)
    h = jnp.maximum(h + b1.reshape(1, -1, 1, 1), 0.0)
    h = jax.lax.conv_general_dilated(h, w2, (1, 1), 'VALID', dimension_numbers=dn)
    h = jnp.maximum(h + b2.reshape(1, -1, 1, 1), 0.0)
    h = jax.lax.conv_general_dilated(h, w3, (1, 1), 'VALID', dimension_numbers=dn)
    h = jnp.maximum(h + b3.reshape(1, -1, 1, 1), 0.0)
    y = jax.lax.conv_general_dilated(h, w4, (1, 1), 'VALID', dimension_numbers=dn)
    return y + b4.reshape(1, -1, 1, 1)


if __name__ == "__main__":
    key = jax.random.PRNGKey(0)
    k_x, k_p, k_x2 = jax.random.split(key, 3)

    B, Cin, H, W = 2, 2, 16, 16
    alpha = 8

    params = init_params(k_p, alpha, cin=Cin)

    # small-batch path (BT=1, grid=2)
    x = jax.random.normal(k_x, (B, Cin, H, W), jnp.float32)
    out = jax.block_until_ready(component1_forward(x, params))
    ref = reference_forward(x, params)
    assert out.shape == (B, 1, H - 4, W - 4), out.shape
    assert jnp.allclose(out, ref, atol=1e-4, rtol=1e-4), \
        float(jnp.max(jnp.abs(out - ref)))

    # lane-packed path (BT=8, 8*144 = 1152 = 9*128 lanes, grid=2)
    B2 = 16
    x2 = jax.random.normal(k_x2, (B2, Cin, H, W), jnp.float32)
    out2 = jax.block_until_ready(component1_forward(x2, params))
    ref2 = reference_forward(x2, params)
    assert out2.shape == (B2, 1, H - 4, W - 4), out2.shape
    assert jnp.allclose(out2, ref2, atol=1e-4, rtol=1e-4), \
        float(jnp.max(jnp.abs(out2 - ref2)))

    print("KERNEL_OK")
</pallas_src>

<mosaic_0001>
module attributes {stable_mosaic.version = 11 : i64} {
  func.func @_component1_kernel(%arg0: i32, %arg1: memref<1x56x144xf32, #tpu.memory_space<vmem>>, %arg2: memref<8x56xf32, #tpu.memory_space<vmem>>, %arg3: memref<3x8x8xf32, #tpu.memory_space<vmem>>, %arg4: memref<3x8x1xf32, #tpu.memory_space<vmem>>, %arg5: memref<1x1x144xf32, #tpu.memory_space<vmem>>) attributes {dimension_semantics = [#tpu.dimension_semantics<parallel>], iteration_bounds = array<i64: 2>, scalar_prefetch = 0 : i64, scratch_operands = 0 : i64, tpu.core_type = #tpu.core_type<tc>, window_params = [{transform_indices = @transform_0, window_bounds = array<i64: 1, 56, 144>}, {pipeline_mode = #tpu.pipeline_mode<synchronous>, transform_indices = @transform_1, window_bounds = array<i64: 8, 56>}, {pipeline_mode = #tpu.pipeline_mode<synchronous>, transform_indices = @transform_2, window_bounds = array<i64: 3, 8, 8>}, {pipeline_mode = #tpu.pipeline_mode<synchronous>, transform_indices = @transform_3, window_bounds = array<i64: 3, 8, 1>}, {transform_indices = @transform_4, window_bounds = array<i64: 1, 1, 144>}]} {
    %c0 = arith.constant 0 : index
    %c0_0 = arith.constant 0 : index
    %c0_1 = arith.constant 0 : index
    %0 = vector.load %arg1[%c0, %c0_0, %c0_1] : memref<1x56x144xf32, #tpu.memory_space<vmem>>, vector<1x56x144xf32>
    %1 = vector.shape_cast %0 : vector<1x56x144xf32> to vector<56x144xf32>
    %c0_2 = arith.constant 0 : index
    %c0_3 = arith.constant 0 : index
    %2 = vector.load %arg2[%c0_2, %c0_3] : memref<8x56xf32, #tpu.memory_space<vmem>>, vector<8x56xf32>
    %cst = arith.constant dense<0.000000e+00> : vector<8x144xf32>
    %3 = tpu.matmul %2, %1, %cst {dimension_numbers = #tpu.dot_dimension_numbers<[1], [0], [0], [1], [0, 0, 1, 1], [], []>} : vector<8x56xf32>, vector<56x144xf32>, vector<8x144xf32> -> vector<8x144xf32>
    %cst_4 = arith.constant 0.000000e+00 : f32
    %4 = vector.broadcast %cst_4 : f32 to vector<8x144xf32>
    %5 = arith.maximumf %3, %4 : vector<8x144xf32>
    %c0_5 = arith.constant 0 : index
    %c0_6 = arith.constant 0 : index
    %c0_7 = arith.constant 0 : index
    %6 = vector.load %arg3[%c0_5, %c0_6, %c0_7] : memref<3x8x8xf32, #tpu.memory_space<vmem>>, vector<1x8x8xf32>
    %7 = vector.shape_cast %6 : vector<1x8x8xf32> to vector<8x8xf32>
    %cst_8 = arith.constant dense<0.000000e+00> : vector<8x144xf32>
    %8 = tpu.matmul %7, %5, %cst_8 {dimension_numbers = #tpu.dot_dimension_numbers<[1], [0], [0], [1], [0, 0, 1, 1], [], []>} : vector<8x8xf32>, vector<8x144xf32>, vector<8x144xf32> -> vector<8x144xf32>
    %c0_9 = arith.constant 0 : index
    %c0_10 = arith.constant 0 : index
    %c0_11 = arith.constant 0 : index
    %9 = vector.load %arg4[%c0_9, %c0_10, %c0_11] : memref<3x8x1xf32, #tpu.memory_space<vmem>>, vector<1x8x1xf32>
    %10 = vector.shape_cast %9 : vector<1x8x1xf32> to vector<8x1xf32>
    %11 = vector.broadcast %10 : vector<8x1xf32> to vector<8x144xf32>
    %12 = arith.addf %8, %11 : vector<8x144xf32>
    %cst_12 = arith.constant 0.000000e+00 : f32
    %13 = vector.broadcast %cst_12 : f32 to vector<8x144xf32>
    %14 = arith.maximumf %12, %13 : vector<8x144xf32>
    %c1 = arith.constant 1 : index
    %c0_13 = arith.constant 0 : index
    %c0_14 = arith.constant 0 : index
    %15 = vector.load %arg3[%c1, %c0_13, %c0_14] : memref<3x8x8xf32, #tpu.memory_space<vmem>>, vector<1x8x8xf32>
    %16 = vector.shape_cast %15 : vector<1x8x8xf32> to vector<8x8xf32>
    %cst_15 = arith.constant dense<0.000000e+00> : vector<8x144xf32>
    %17 = tpu.matmul %16, %14, %cst_15 {dimension_numbers = #tpu.dot_dimension_numbers<[1], [0], [0], [1], [0, 0, 1, 1], [], []>} : vector<8x8xf32>, vector<8x144xf32>, vector<8x144xf32> -> vector<8x144xf32>
    %c1_16 = arith.constant 1 : index
    %c0_17 = arith.constant 0 : index
    %c0_18 = arith.constant 0 : index
    %18 = vector.load %arg4[%c1_16, %c0_17, %c0_18] : memref<3x8x1xf32, #tpu.memory_space<vmem>>, vector<1x8x1xf32>
    %19 = vector.shape_cast %18 : vector<1x8x1xf32> to vector<8x1xf32>
    %20 = vector.broadcast %19 : vector<8x1xf32> to vector<8x144xf32>
    %21 = arith.addf %17, %20 : vector<8x144xf32>
    %cst_19 = arith.constant 0.000000e+00 : f32
    %22 = vector.broadcast %cst_19 : f32 to vector<8x144xf32>
    %23 = arith.maximumf %21, %22 : vector<8x144xf32>
    %c2 = arith.constant 2 : index
    %c0_20 = arith.constant 0 : index
    %c0_21 = arith.constant 0 : index
    %24 = vector.load %arg3[%c2, %c0_20, %c0_21] : memref<3x8x8xf32, #tpu.memory_space<vmem>>, vector<1x8x8xf32>
    %25 = vector.shape_cast %24 : vector<1x8x8xf32> to vector<8x8xf32>
    %26 = vector.extract_strided_slice %25 {offsets = [0, 0], sizes = [1, 8], strides = [1, 1]} : vector<8x8xf32> to vector<1x8xf32>
    %c2_22 = arith.constant 2 : index
    %c0_23 = arith.constant 0 : index
    %c0_24 = arith.constant 0 : index
    %27 = vector.load %arg4[%c2_22, %c0_23, %c0_24] : memref<3x8x1xf32, #tpu.memory_space<vmem>>, vector<1x8x1xf32>
    %28 = vector.shape_cast %27 : vector<1x8x1xf32> to vector<8x1xf32>
    %29 = vector.extract_strided_slice %28 {offsets = [0, 0], sizes = [1, 1], strides = [1, 1]} : vector<8x1xf32> to vector<1x1xf32>
    %cst_25 = arith.constant dense<0.000000e+00> : vector<1x144xf32>
    %30 = tpu.matmul %26, %23, %cst_25 {dimension_numbers = #tpu.dot_dimension_numbers<[1], [0], [0], [1], [0, 0, 1, 1], [], []>} : vector<1x8xf32>, vector<8x144xf32>, vector<1x144xf32> -> vector<1x144xf32>
    %31 = vector.broadcast %29 : vector<1x1xf32> to vector<1x144xf32>
    %32 = arith.addf %30, %31 : vector<1x144xf32>
    %c0_26 = arith.constant 0 : index
    %c0_27 = arith.constant 0 : index
    %c0_28 = arith.constant 0 : index
    %33 = vector.load %arg5[%c0_26, %c0_27, %c0_28] : memref<1x1x144xf32, #tpu.memory_space<vmem>>, vector<1x1x144xf32>
    %34 = vector.shape_cast %33 : vector<1x1x144xf32> to vector<1x144xf32>
    %35 = vector.shape_cast %32 : vector<1x144xf32> to vector<1x1x144xf32>
    tpu.vector_store %arg5[%c0_26, %c0_27, %c0_28], %35 {strides = array<i32>} : memref<1x1x144xf32, #tpu.memory_space<vmem>>, vector<1x1x144xf32>,
    return
  }
  func.func @transform_0(%arg0: i32) -> (i32, i32, i32) {
    %c0_i32 = arith.constant 0 : i32
    %c0_i32_0 = arith.constant 0 : i32
    %c0_i32_1 = arith.constant 0 : i32
    return %arg0, %c0_i32, %c0_i32_0 : i32, i32, i32
  }
  func.func @transform_1(%arg0: i32) -> (i32, i32) {
    %c0_i32 = arith.constant 0 : i32
    %c0_i32_0 = arith.constant 0 : i32
    %c0_i32_1 = arith.constant 0 : i32
    return %c0_i32, %c0_i32_0 : i32, i32
  }
  func.func @transform_2(%arg0: i32) -> (i32, i32, i32) {
    %c0_i32 = arith.constant 0 : i32
    %c0_i32_0 = arith.constant 0 : i32
    %c0_i32_1 = arith.constant 0 : i32
    %c0_i32_2 = arith.constant 0 : i32
    return %c0_i32, %c0_i32_0, %c0_i32_1 : i32, i32, i32
  }
  func.func @transform_3(%arg0: i32) -> (i32, i32, i32) {
    %c0_i32 = arith.constant 0 : i32
    %c0_i32_0 = arith.constant 0 : i32
    %c0_i32_1 = arith.constant 0 : i32
    %c0_i32_2 = arith.constant 0 : i32
    return %c0_i32, %c0_i32_0, %c0_i32_1 : i32, i32, i32
  }
  func.func @transform_4(%arg0: i32) -> (i32, i32, i32) {
    %c0_i32 = arith.constant 0 : i32
    %c0_i32_0 = arith.constant 0 : i32
    %c0_i32_1 = arith.constant 0 : i32
    return %arg0, %c0_i32, %c0_i32_0 : i32, i32, i32
  }
}

</mosaic_0001>

<bundles_post_ra>
// kernel: tpu_custom_call.1
= control target key start
LH: loop header
LB: loop body
LE: loop exit
PB: predicated region body
PF: predicated region fallthrough
CT: control target
= control target key end

     0   :  { %s977_s0 = inlined_call_operand.hbm [shape: f32[2,56,144], index: 0, kind: input, shape index: {}]   ;;  %s978_s1 = inlined_call_operand.hbm [shape: f32[8,56], index: 1, kind: input, shape index: {}]   ;;  %s979_s2 = inlined_call_operand.vmem [shape: f32[3,8,8], index: 2, kind: input, shape index: {}]   ;;  %s980_s3 = inlined_call_operand.vmem [shape: f32[3,8,1], index: 3, kind: input, shape index: {}]   ;;  %s981_s4 = inlined_call_operand.hbm [shape: f32[2,1,144], index: 4, kind: output, shape index: {}]  }
   0x1   :  { %982 = sst [smem:[#allocation11_spill]] %s978_s1 }
   0x2   :  { %9 = vsyncpa [#allocation3], 0 }
   0x3   :  { %11 = vsyncpa [#allocation3 + $0x1], 0 }
   0x4   :  { %12 = vsyncpa [#allocation6], 0 }
   0x5   :  { %13 = vsyncpa [#allocation4], 0 }
   0x6   :  { %15 = vsyncpa [#allocation4 + $0x1], 0  ;;  %s810_s15 = smov 0   ;;  %s812_s16 = smov 0  }
   0x7   :  { %s814_s17 = smov 0   ;;  %s816_s18 = smov 0  }
   0x8 LB: > { %s831_s19 = sadd.s32 4294967295, %s779_s18   ;;  %s560_s20 = sadd.s32 4294967294, %s779_s18   ;;  %s779_s18 = sphi %s816_s18, %s994_s18   ;;  %s775_s17 = sphi %s814_s17, %s993_s17   ;;  %s771_s16 = sphi %s812_s16, %s992_s16   ;;  %s767_s15 = sphi %s810_s15, %s991_s15  }
   0x9   : > { %s835_s21 = sadd.s32 1, %s779_s18   ;;  %s28_s22 = sadd.s32 1, %s775_s17 }
   0xa   : > { %s25_s23 = ssub.s32 %s779_s18, %s835_s21  ;;  %p35_p0 = scmp.ne.s32.totalorder %s775_s17, %s771_s16 }
   0xb   : > { %p26_p1 = scmp.eq.s32.totalorder %s25_s23, 0  ;;  %p36_p2 = scmp.eq.s32.totalorder %s779_s18, 0 }
   0xc   : > { %p41_p3 = scmp.ne.s32.totalorder %s771_s16, %s767_s15  ;;  %p42_p4 = scmp.eq.s32.totalorder %s831_s19, 0 }
   0xd   : > { %s847_s24 = scalar_select %p26_p1, %s775_s17, %s28_s22  }
   0xe   : > { %p849_p5 = por %p36_p2, %p35_p0  ;;  %p855_p6 = por %p42_p4, %p41_p3 }
   0xf   : > { %p128_p7 = scmp.eq.s32.totalorder %s831_s19, 1  ;;  %p134_p8 = scmp.eq.s32.totalorder %s560_s20, 1 }
  0x10   : > { %p561_p9 = scmp.ge.s32.totalorder %s779_s18, 1  ;;  %p141_p10 = scmp.lt.s32.totalorder %s779_s18, 3 }
  0x11   : > { %p862_p11 = por %p128_p7, %p35_p0  ;;  %p866_p12 = por %p134_p8, %p41_p3 }
  0x12   : > { %p870_p13 = pnand %p561_p9, %p141_p10  ;;  %s988_s1 = sld [smem:[#allocation11_spill]] }
  0x13   : > { %s781_s7 = smov [#allocation5]   ;;  %p608_p3 = scmp.lt.s32.totalorder %s779_s18, 2 }
  0x14   : > { %p595_p1 = pneg %p870_p13  ;;  %s155_s8 = sshll.u32 %s781_s7, 4  ;;  %s156_s8 = int_to_ptr.vmem [resolvable:$true] %s155_s8 }
  0x15   : > { %s172_s9 = sand.u32 1, %s775_s17   ;;  %p886_p7 = pnand %p608_p3, %p849_p5 }
  0x16   : > { %p596_p2 = pnand %p595_p1, %p42_p4  ;;  %s584_s11 = smul.u32 112, %s172_s9 }
  0x17   : > { %s585_s12 = smul.u32 112, %s779_s18  ;;  %s173_s5 = scalar_lea.sflag [#allocation3], %s172_s9 }
  0x18   : > { %s153_s6 = sshll.u32 %s988_s1, 4  ;;  %s176_s22 = scalar_lea.vmem [#allocation2], %s584_s11  ;;  %s154_s6 = int_to_ptr.hbm [resolvable:$true] %s153_s6 }
  0x19   : > { %598 = dma.hbm_to_vmem [thread:$0]  (!%p596_p2), %s154_s6, 128, %s156_s8, [#allocation6]  }
  0x1a   : > { %s181_s20 = scalar_lea.hbm %s977_s0, %s585_s12  ;;  %s184_s23 = sshll.u32 %s176_s22, 4  ;;  %s185_s23 = int_to_ptr.vmem [resolvable:$true] %s184_s23 }
  0x1b   : > { %s182_s30 = sshll.u32 %s181_s20, 4  ;;  %p683_p8 = pneg %p886_p7  ;;  %s183_s30 = int_to_ptr.hbm [resolvable:$true] %s182_s30 }
  0x1c   : > { %s679_s7 = sshra.s32 %s183_s30, 4  ;;  %s686_s1 = scalar_lea.hbm %s977_s0, 224  ;;  %s680_s7 = int_to_ptr.hbm [resolvable:$true] %s679_s7 }
  0x1d   : > { %s681_s25 = scalar_lea.hbm %s680_s7, 112  ;;  %p687_p1 = scmp.lt.s32.totalorder %s680_s7, %s977_s0 }
  0x1e   : > { %p682_p5 = scmp.ne.s32.totalorder %s680_s7, %s681_s25  ;;  %p688_p2 = scmp.lt.s32.totalorder %s686_s1, %s681_s25 }
  0x20   : > { %p684_p9 = pnand %p683_p8, %p682_p5  ;;  %p689_p3 = por %p688_p2, %p687_p1 }
  0x22   : > { %p685_p10 = pneg %p684_p9 }
  0x24   : > { %p690_p0 = pnand %p689_p3, %p685_p10 }
  0x26   : > { %693 = shalt.err (!%p690_p0)
}
  0x27   : > { %s782_s9 = smov 256   ;;  %s783_s11 = smov 16  }
  0x28   : > { %602 = dma.hbm_to_vmem [thread:$0]  (!%p886_p7), %s183_s30, 1792, %s185_s23, %s173_s5, %s782_s9, %s782_s9, %s783_s11  }
  0x29   : > { %196 = sbr.rel (%p870_p13) target bundleno = 606 (0x25e), region = 36  ;;  %s907_s14 = sand.u32 (!%p870_p13), 1, %s771_s16  }
  0x2a   : > { %s586_s20 = smul.u32 (!%p870_p13), 112, %s907_s14  ;;  %s199_s22 = scalar_lea.sflag (!%p870_p13), [#allocation3], %s907_s14 }
  0x2c   : > { %s202_s1 = scalar_lea.vmem (!%p870_p13), [#allocation2], %s586_s20 }
  0x2e   : > { %754 = dma.done.wait (%p855_p6), %s199_s22, 1792  }
  0x2f   : > { %756 = vsyncadd (%p855_p6), %s199_s22, 4294965504 }
  0x30   : > { %758 = dma.done.wait (%p42_p4), [#allocation6], 128  }
  0x31   : > { %760 = vsyncadd (%p42_p4), [#allocation6], 4294967168  ;;  %v245_v0 = vld [vmem:[%s202_s1 + $0x60] sm:$0xff]  ;;  %v246_v1 = vld [vmem:[%s202_s1 + $0x68] sm:$0xff]  ;;  %vm248_vm0 = vcmask 457728   ;;  %v784_v16 = vmov 0   ;;  %v459_v41 = vlaneseq }
  0x32   : > { %v243_v2 = vld [vmem:[%s202_s1 + $0x50] sm:$0xff]  ;;  %261 = vmatpush.msra.mxu0 %v245_v0  ;;  %281 = vmatpush.msra.mxu1 %v246_v1  ;;  %v244_v3 = vld [vmem:[%s202_s1 + $0x58] sm:$0xff]  ;;  %v241_v4 = vld [vmem:[%s202_s1 + $0x40] sm:$0xff]  ;;  %vm301_vm1 = vcmask 64512   ;;  %s567_s9 = sshll.u32 %s907_s14, 1  ;;  %s581_s11 = sshll.u32 %s831_s19, 1 }
  0x33   : > { %v242_v5 = vld [vmem:[%s202_s1 + $0x48] sm:$0xff]  ;;  %v239_v6 = vld [vmem:[%s202_s1 + $0x30] sm:$0xff]  ;;  %v240_v7 = vld [vmem:[%s202_s1 + $0x38] sm:$0xff]  ;;  %647 = vset.pattern.permute.xlu0 %v784_v16  ;;  %648 = vset.pattern.permute.xlu1 %v784_v16  ;;  %s232_s26 = scalar_lea.vmem [#allocation7], %s567_s9  ;;  %vm456_vm2 = vcmask 1040384   ;;  %vm461_vm3 = vcmp.lt.s32.totalorder %v459_v41, 144 }
  0x34   : > { %262 = vmatpush.msra.mxu0 %v243_v2  ;;  %282 = vmatpush.msra.mxu1 %v244_v3  ;;  %v237_v8 = vld [vmem:[%s202_s1 + $0x20] sm:$0xff]  ;;  %v238_v9 = vld [vmem:[%s202_s1 + $0x28] sm:$0xff]  ;;  %v235_v10 = vld [vmem:[%s202_s1 + $0x10] sm:$0xff]  ;;  %s477_s29 = sshll.u32 %s232_s26, 4  ;;  %s465_s19 = scalar_lea.sflag [#allocation4], %s907_s14  ;;  %s478_s29 = int_to_ptr.vmem [resolvable:$true] %s477_s29 }
  0x35   : > { %v236_v11 = vld [vmem:[%s202_s1 + $0x18] sm:$0xff]  ;;  %v233_v12 = vld [vmem:[%s202_s1] sm:$0xff]  ;;  %v234_v13 = vld [vmem:[%s202_s1 + $0x8] sm:$0xff]  ;;  %s475_s1 = scalar_lea.hbm %s981_s4, %s581_s11  ;;  %s729_s25 = scalar_lea.hbm %s981_s4, 4 }
  0x36   : > { %263 = vmatpush.msra.mxu0 %v241_v4  ;;  %283 = vmatpush.msra.mxu1 %v242_v5  ;;  %v247_v14 = vld [vmem:[#allocation5] sm:$0xff]  ;;  %v573_v17 = vld [vmem:[%s980_s3 + $0x8] sm:$0xff]  ;;  %v577_v31 = vld [vmem:[%s980_s3 + $0x10] sm:$0xff]  ;;  %s479_s10 = sshll.u32 %s475_s1, 4  ;;  %s480_s10 = int_to_ptr.hbm [resolvable:$true] %s479_s10 }
  0x37   : > { %v295_v15 = vld [vmem:[%s980_s3] sm:$0xff]  ;;  %v572_v30 = vld [vmem:[%s979_s2 + $0x8] sm:$0xff]  ;;  %407 = vperm.xlu1 %648, %v577_v31   ;;  %v576_v39 = vld [vmem:[%s979_s2 + $0x10] sm:$0xff]  ;;  %s723_s23 = sshra.s32 %s480_s10, 4  ;;  %s724_s23 = int_to_ptr.hbm [resolvable:$true] %s723_s23 }
  0x38   : > { %264 = vmatpush.msra.mxu0 %v239_v6  ;;  %284 = vmatpush.msra.mxu1 %v240_v7  ;;  %v294_v22 = vld [vmem:[%s979_s2] sm:$0xff]  ;;  %s725_s30 = scalar_lea.hbm %s724_s23, 2  ;;  %p730_p0 = scmp.lt.s32.totalorder %s724_s23, %s981_s4 }
  0x39   : > { %298 = vperm.xlu0 %647, %v295_v15   ;;  %p726_p4 = scmp.ne.s32.totalorder %s724_s23, %s725_s30  ;;  %p731_p7 = scmp.lt.s32.totalorder %s729_s25, %s725_s30 }
  0x3a   : > { %265 = vmatpush.msra.mxu0 %v237_v8  ;;  %285 = vmatpush.msra.mxu1 %v238_v9 }
  0x3b   : > { %p727_p6 = pnand %p726_p4, %p862_p11  ;;  %p732_p5 = por %p731_p7, %p730_p0 }
  0x3c   : > { %266 = vmatpush.msra.mxu0 %v235_v10  ;;  %286 = vmatpush.msra.mxu1 %v236_v11 }
  0x3d   : > { %p728_p13 = pneg %p727_p6 }
  0x3e   : > { %267 = vmatpush.msra.mxu0 %v233_v12  ;;  %287 = vmatpush.msra.mxu1 %v234_v13 }
  0x3f   : > { %568 = vmatmul.msk.f32.vlgmr.msra.gmra.mxu0 %vm248_vm0, %v247_v14  ;;  %569 = vmatmul.msk.f32.vlgmr.msra.gmra.mxu1 %vm248_vm0, %v247_v14  ;;  %p733_p8 = pnand %p732_p5, %p728_p13 }
  0x41   : > { %353 = vperm.xlu0 %647, %v573_v17  }
  0xa9   : > { %v408_v40 = vpop.permute.xlu1 %407 }
  0xab   : > { %v299_v23 = vpop.permute.xlu0 %298 }
  0xb3   : > { %v354_v32 = vpop.permute.xlu0 %353 }
  0xbc   : > { %v269_v18 = vpop.f32.mrf.mxu0  ;;  %v289_v19 = vpop.f32.mrf.mxu1 }
  0xbd   : > { %v292_v20 = vmax.f32 %v269_v18, 0.0  ;;  %v293_v21 = vmax.f32 %v289_v19, 0.0 }
  0xbf   : > { %320 = vmatpush.msra.mxu2 %v292_v20  ;;  %340 = vmatpush.msra.mxu3 %v293_v21 }
  0xc0   : > { %570 = vmatmul.msk.f32.vlgmr.msra.gmra.mxu2 %vm301_vm1, %v294_v22  ;;  %571 = vmatmul.msk.f32.vlgmr.msra.gmra.mxu3 %vm301_vm1, %v294_v22 }
 0x143   : > { %v322_v24 = vpop.f32.mrf.mxu2  ;;  %v342_v25 = vpop.f32.mrf.mxu3 }
 0x144   : > { %v323_v26 = vadd.f32 %v322_v24, %v299_v23  ;;  %v343_v27 = vadd.f32 %v342_v25, %v299_v23 }
 0x146   : > { %v345_v28 = vmax.f32 %v323_v26, 0.0  ;;  %v346_v29 = vmax.f32 %v343_v27, 0.0 }
 0x148   : > { %374 = vmatpush.msrb.mxu2 %v345_v28  ;;  %394 = vmatpush.msrb.mxu3 %v346_v29 }
 0x149   : > { %574 = vmatmul.msk.f32.vlgmr.msrb.gmra.mxu2 %vm301_vm1, %v572_v30  ;;  %575 = vmatmul.msk.f32.vlgmr.msrb.gmra.mxu3 %vm301_vm1, %v572_v30 }
 0x1cc   : > { %v376_v33 = vpop.f32.mrf.mxu2  ;;  %v396_v34 = vpop.f32.mrf.mxu3 }
 0x1cd   : > { %v377_v35 = vadd.f32 %v376_v33, %v354_v32  ;;  %v397_v36 = vadd.f32 %v396_v34, %v354_v32 }
 0x1cf   : > { %v399_v37 = vmax.f32 %v377_v35, 0.0  ;;  %v400_v38 = vmax.f32 %v397_v36, 0.0 }
 0x1d1   : > { %428 = vmatpush.msra.mxu2 %v399_v37  ;;  %448 = vmatpush.msra.mxu3 %v400_v38 }
 0x1d2   : > { %579 = vmatmul.msk.f32.vlgmr.msra.gmra.mxu3 %vm301_vm1, %v576_v39  ;;  %578 = vmatmul.msk.f32.vlgmr.msra.gmra.mxu2 %vm301_vm1, %v576_v39 }
 0x255   : > { %v450_v42 = vpop.f32.mrf.mxu3  ;;  %v430_v43 = vpop.f32.mrf.mxu2 }
 0x256   : > { %v451_v44 = vadd.f32 %v450_v42, %v408_v40  ;;  %v431_v46 = vadd.f32 %v430_v43, %v408_v40 }
 0x258   : > { %v455_v45 = vrot.slane %v451_v44, 7 }
 0x25a   : > { %v457_v47 = vsel %vm456_vm2, %v431_v46, %v455_v45 }
 0x25b   : > { %463 = vst.msk [vmem:[%s232_s26] sm:$0x3] %vm461_vm3, %v457_v47 }
 0x25c   : > { %736 = shalt.err (!%p733_p8)
}
 0x25d   : > { %593 = dma.vmem_to_hbm [thread:$0]  (%p862_p11), %s478_s29, 32, %s480_s10, %s465_s19  }
 0x25e PF: > { %s491_s14 = sand.u32 1, %s767_s15   ;;  %p990_p9 = scmp.ge.s32.totalorder %s779_s18, 2 }
 0x25f   : > { %s492_s13 = scalar_lea.sflag [#allocation4], %s491_s14 }
 0x260   : > { %p604_p10 = pnand %p990_p9, %p866_p12 }
 0x262   : > { %p605_p1 = pneg %p604_p10 }
 0x264   : > { %762 = dma.done.wait (%p605_p1), %s492_s13, 32  }
 0x265   : > { %764 = vsyncadd (%p605_p1), %s492_s13, 4294967264  ;;  %p18_p2 = scmp.ge.s32.totalorder %s835_s21, 4   ;;  %s991_s15 = smov %s771_s16 }
 0x266   : > { %s992_s16 = smov %s775_s17  ;;  %s993_s17 = smov %s847_s24 }
 0x267   : > { %s994_s18 = smov %s835_s21  ;;  %20 = sbr.rel (!%p18_p2) target bundleno = 8 (0x8), region = 89 }
 0x26c   :  { %498 = vsyncpa [#allocation3], 1 }
 0x26d   :  { %500 = vsyncpa [#allocation3 + $0x1], 1 }
 0x26e   :  { %501 = vsyncpa [#allocation6], 1 }
 0x26f   :  { %502 = vsyncpa [#allocation4], 1 }
 0x270   :  { %504 = vsyncpa [#allocation4 + $0x1], 1 }

</bundles_post_ra>
